<compile_context>
chip_gen: v7x
topology: tpu7x:2x2x1
jax: 0.10.0
libtpu: 0.0.40
codegen_flags: <defaults>
</compile_context>

<pallas_src>
import jax
import jax.numpy as jnp
from jax.experimental import pallas as pl
from jax.experimental.pallas import tpu as pltpu


def _convt_kernel(x_ref, w_ref, b_ref, o_ref):
    # x_ref: (1, Cin, ts)   w_ref: (4*Cout, Cin)   b_ref: (4*Cout, 1)   o_ref: (1, 4*Cout, ts)
    acc = jnp.dot(w_ref[...], x_ref[0], preferred_element_type=jnp.float32)
    o_ref[0] = (acc + b_ref[...]).astype(o_ref.dtype)


def _pick_spatial_tile(S, Cin, C4, itemsize):
    """Largest lane tile (multiple of 128 when tiling) keeping the double-buffered
    working set comfortably under the default scoped-VMEM limit."""
    budget = 24 * 1024 * 1024
    w_bytes = 2 * C4 * (Cin + 1) * itemsize        # weight + bias blocks (double-buffered)
    per_lane = 2 * (Cin + C4) * itemsize           # x tile + out tile, double-buffered
    t = max(128, (budget - w_bytes) // per_lane)
    t = min(t, 4096)
    if t >= S:
        return S                                   # single full-extent block per batch
    return max(128, (t // 128) * 128)              # lane-dense tiles; ragged tail via cdiv


def _convt_matmul(x2r, w2t, b2):
    """Y[n] = w2t @ x2r[n] + b2, tiled over (batch, spatial)."""
    N, Cin, S = x2r.shape
    C4 = w2t.shape[0]
    ts = _pick_spatial_tile(S, Cin, C4, x2r.dtype.itemsize)

    cost = pl.CostEstimate(
        flops=2 * N * C4 * Cin * S,
        transcendentals=0,
        bytes_accessed=(N * Cin * S + C4 * Cin + C4 + N * C4 * S) * x2r.dtype.itemsize,
    )

    return pl.pallas_call(
        _convt_kernel,
        out_shape=jax.ShapeDtypeStruct((N, C4, S), x2r.dtype),
        grid_spec=pltpu.PrefetchScalarGridSpec(
            num_scalar_prefetch=0,
            grid=(N, pl.cdiv(S, ts)),
            in_specs=[
                pl.BlockSpec((1, Cin, ts), lambda n, s: (n, 0, s)),
                pl.BlockSpec((C4, Cin), lambda n, s: (0, 0)),
                pl.BlockSpec((C4, 1), lambda n, s: (0, 0)),
            ],
            out_specs=pl.BlockSpec((1, C4, ts), lambda n, s: (n, 0, s)),
        ),
        compiler_params=pltpu.CompilerParams(
            dimension_semantics=("parallel", "parallel"),
        ),
        cost_estimate=cost,
    )(x2r, w2t, b2)


def up_forward(x1, x2, weight, bias):
    """Replicates Up.forward.

    x1:     (N, C1, H1, W1)        skip connection, NCHW
    x2:     (N, Cin, Hin, Win)     NCHW
    weight: (Cin, Cout, 2, 2)      ConvTranspose2d weight (PyTorch layout)
    bias:   (Cout,)
    returns (N, Cout + C1, H1, W1)
    """
    N, Cin, Hin, Win = x2.shape
    Cout = weight.shape[1]
    H1, W1 = x1.shape[2], x1.shape[3]
    S = Hin * Win
    C4 = 4 * Cout

    # --- ConvTranspose2d(k=2, s=2) as a per-batch matmul (Pallas hot path) ---
    x2r = x2.reshape(N, Cin, S)                                   # free reshape, no transpose
    # Rows of w2t ordered (co, ki, kj): w2t[co*4 + ki*2 + kj, ci] = weight[ci, co, ki, kj]
    w2t = jnp.transpose(weight, (1, 2, 3, 0)).reshape(C4, Cin)    # tiny
    b2 = jnp.repeat(bias, 4).reshape(C4, 1)                       # bias[co] per (co,ki,kj) row

    y = _convt_matmul(x2r, w2t, b2)                               # (N, 4*Cout, Hin*Win)

    # --- Interleave the 2x2 taps back into the 2x-upsampled NCHW tensor ------
    up = y.reshape(N, Cout, 2, 2, Hin, Win)                       # (n, co, ki, kj, i, j)
    up = jnp.transpose(up, (0, 1, 4, 2, 5, 3))                    # (n, co, i, ki, j, kj)
    up = up.reshape(N, Cout, 2 * Hin, 2 * Win)                    # out[n,co,2i+ki,2j+kj]

    # --- F.pad to x1's spatial size (negative diff = crop, like torch) -------
    diffY = H1 - 2 * Hin
    diffX = W1 - 2 * Win
    if diffY != 0 or diffX != 0:
        up = jax.lax.pad(
            up, jnp.zeros((), up.dtype),
            ((0, 0, 0), (0, 0, 0),
             (diffY // 2, diffY - diffY // 2, 0),
             (diffX // 2, diffX - diffX // 2, 0)),
        )

    # --- concat along channel dim --------------------------------------------
    return jnp.concatenate([up, x1], axis=1)


def _reference(x1, x2, weight, bias):
    """Pure-JAX reference of the same math (sanity check)."""
    N, Cin, Hin, Win = x2.shape
    Cout = weight.shape[1]
    y = jnp.einsum("ncij,cokl->noikjl", x2, weight)
    y = y.reshape(N, Cout, 2 * Hin, 2 * Win) + bias[None, :, None, None]
    diffY = x1.shape[2] - y.shape[2]
    diffX = x1.shape[3] - y.shape[3]
    y = jax.lax.pad(
        y, jnp.zeros((), y.dtype),
        ((0, 0, 0), (0, 0, 0),
         (diffY // 2, diffY - diffY // 2, 0),
         (diffX // 2, diffX - diffX // 2, 0)),
    )
    return jnp.concatenate([y, x1], axis=1)


if __name__ == "__main__":
    # Make the XLA einsum reference and the in-kernel dot both full-f32 accurate.
    jax.config.update("jax_default_matmul_precision", "highest")

    # Small deterministic example consistent with the module:
    #   in_ch = 8 (channels of x2), out_ch = 4.
    #   x2: (2, 8, 16, 16) -> upsampled to (2, 4, 32, 32)
    #   x1: (2, 4, 35, 35) skip connection -> exercises the asymmetric F.pad path
    #   output: (2, 8, 35, 35)
    N, in_ch, out_ch = 2, 8, 4
    Hin = Win = 16
    H1 = W1 = 2 * Hin + 3

    key = jax.random.PRNGKey(0)
    k1, k2, kw, kb = jax.random.split(key, 4)

    x1 = jax.random.normal(k1, (N, out_ch, H1, W1), dtype=jnp.float32)
    x2 = jax.random.normal(k2, (N, in_ch, Hin, Win), dtype=jnp.float32)

    # Deterministic parameter init (PyTorch ConvTranspose2d weight layout (in_ch, out_ch, kH, kW)).
    fan = in_ch * 2 * 2
    bound = 1.0 / float(fan) ** 0.5
    weight = jax.random.uniform(kw, (in_ch, out_ch, 2, 2), jnp.float32, -bound, bound)
    bias = jax.random.uniform(kb, (out_ch,), jnp.float32, -bound, bound)

    up_jit = jax.jit(up_forward)

    # Case 1: asymmetric pad path.
    out = jax.block_until_ready(up_jit(x1, x2, weight, bias))
    ref = _reference(x1, x2, weight, bias)
    assert out.shape == (N, out_ch + out_ch, H1, W1), out.shape
    assert jnp.allclose(out, ref, atol=1e-5, rtol=1e-5), float(jnp.max(jnp.abs(out - ref)))

    # Case 2: exact-fit skip connection (no pad) — the common UNet fast path.
    x1b = jax.random.normal(k1, (N, out_ch, 2 * Hin, 2 * Win), dtype=jnp.float32)
    out2 = jax.block_until_ready(up_jit(x1b, x2, weight, bias))
    ref2 = _reference(x1b, x2, weight, bias)
    assert out2.shape == (N, out_ch + out_ch, 2 * Hin, 2 * Win), out2.shape
    assert jnp.allclose(out2, ref2, atol=1e-5, rtol=1e-5), float(jnp.max(jnp.abs(out2 - ref2)))

    print("KERNEL_OK")
</pallas_src>

<mosaic_0001>
module attributes {stable_mosaic.version = 11 : i64} {
  func.func @_convt_kernel(%arg0: i32, %arg1: i32, %arg2: memref<1x8x256xf32, #tpu.memory_space<vmem>>, %arg3: memref<16x8xf32, #tpu.memory_space<vmem>>, %arg4: memref<16x1xf32, #tpu.memory_space<vmem>>, %arg5: memref<1x16x256xf32, #tpu.memory_space<vmem>>) attributes {dimension_semantics = [#tpu.dimension_semantics<parallel>, #tpu.dimension_semantics<parallel>], iteration_bounds = array<i64: 2, 1>, scalar_prefetch = 0 : i64, scratch_operands = 0 : i64, tpu.core_type = #tpu.core_type<tc>, window_params = [{transform_indices = @transform_0, window_bounds = array<i64: 1, 8, 256>}, {pipeline_mode = #tpu.pipeline_mode<synchronous>, transform_indices = @transform_1, window_bounds = array<i64: 16, 8>}, {pipeline_mode = #tpu.pipeline_mode<synchronous>, transform_indices = @transform_2, window_bounds = array<i64: 16, 1>}, {transform_indices = @transform_3, window_bounds = array<i64: 1, 16, 256>}]} {
    %c0 = arith.constant 0 : index
    %c0_0 = arith.constant 0 : index
    %0 = vector.load %arg3[%c0, %c0_0] : memref<16x8xf32, #tpu.memory_space<vmem>>, vector<16x8xf32>
    %c0_1 = arith.constant 0 : index
    %c0_2 = arith.constant 0 : index
    %c0_3 = arith.constant 0 : index
    %1 = vector.load %arg2[%c0_1, %c0_2, %c0_3] : memref<1x8x256xf32, #tpu.memory_space<vmem>>, vector<1x8x256xf32>
    %2 = vector.shape_cast %1 : vector<1x8x256xf32> to vector<8x256xf32>
    %cst = arith.constant dense<0.000000e+00> : vector<16x256xf32>
    %3 = tpu.matmul %0, %2, %cst {dimension_numbers = #tpu.dot_dimension_numbers<[1], [0], [0], [1], [0, 0, 1, 1], [], []>, precision = #tpu.contract_precision<fp32>} : vector<16x8xf32>, vector<8x256xf32>, vector<16x256xf32> -> vector<16x256xf32>
    %c0_4 = arith.constant 0 : index
    %c0_5 = arith.constant 0 : index
    %4 = vector.load %arg4[%c0_4, %c0_5] : memref<16x1xf32, #tpu.memory_space<vmem>>, vector<16x1xf32>
    %5 = vector.broadcast %4 : vector<16x1xf32> to vector<16x256xf32>
    %6 = arith.addf %3, %5 : vector<16x256xf32>
    %c0_6 = arith.constant 0 : index
    %c0_7 = arith.constant 0 : index
    %c0_8 = arith.constant 0 : index
    %7 = vector.load %arg5[%c0_6, %c0_7, %c0_8] : memref<1x16x256xf32, #tpu.memory_space<vmem>>, vector<1x16x256xf32>
    %8 = vector.shape_cast %7 : vector<1x16x256xf32> to vector<16x256xf32>
    %9 = vector.shape_cast %6 : vector<16x256xf32> to vector<1x16x256xf32>
    tpu.vector_store %arg5[%c0_6, %c0_7, %c0_8], %9 {strides = array<i32>} : memref<1x16x256xf32, #tpu.memory_space<vmem>>, vector<1x16x256xf32>,
    return
  }
  func.func @transform_0(%arg0: i32, %arg1: i32) -> (i32, i32, i32) {
    %c0_i32 = arith.constant 0 : i32
    %c0_i32_0 = arith.constant 0 : i32
    return %arg0, %c0_i32, %arg1 : i32, i32, i32
  }
  func.func @transform_1(%arg0: i32, %arg1: i32) -> (i32, i32) {
    %c0_i32 = arith.constant 0 : i32
    %c0_i32_0 = arith.constant 0 : i32
    %c0_i32_1 = arith.constant 0 : i32
    return %c0_i32, %c0_i32_0 : i32, i32
  }
  func.func @transform_2(%arg0: i32, %arg1: i32) -> (i32, i32) {
    %c0_i32 = arith.constant 0 : i32
    %c0_i32_0 = arith.constant 0 : i32
    %c0_i32_1 = arith.constant 0 : i32
    return %c0_i32, %c0_i32_0 : i32, i32
  }
  func.func @transform_3(%arg0: i32, %arg1: i32) -> (i32, i32, i32) {
    %c0_i32 = arith.constant 0 : i32
    %c0_i32_0 = arith.constant 0 : i32
    return %arg0, %c0_i32, %arg1 : i32, i32, i32
  }
}

</mosaic_0001>

<bundles_post_ra>
// kernel: up_forward.1
= control target key start
LH: loop header
LB: loop body
LE: loop exit
PB: predicated region body
PF: predicated region fallthrough
CT: control target
= control target key end

     0   :  { %s948_s12 = smov 0   ;;  %s950_s13 = smov 0   ;;  %s1009_s0 = inlined_call_operand.vmem [shape: f32[2,8,256], index: 0, kind: input, shape index: {}]   ;;  %s1010_s1 = inlined_call_operand.vmem [shape: f32[16,8], index: 1, kind: input, shape index: {}]   ;;  %s1011_s2 = inlined_call_operand.vmem [shape: f32[16,1], index: 2, kind: input, shape index: {}]   ;;  %s1012_s3 = inlined_call_operand.vmem [shape: f32[2,16,256], index: 3, kind: output, shape index: {}]  }
   0x1   :  { %s952_s14 = smov 0  }
   0x2 LB: > { %s25_s15 = sadd.s32 1, %s920_s13  ;;  %p842_p0 = scmp.ge.s32.totalorder %s924_s14, 1  ;;  %s924_s14 = sphi %s952_s14, %s13_s14   ;;  %s920_s13 = sphi %s950_s13, %s1014_s13   ;;  %s916_s12 = sphi %s948_s12, %s1013_s12  }
   0x3   : > { %p27_p1 = scmp.ge.s32.totalorder %s25_s15, 2  ;;  %p158_p2 = scmp.lt.s32.totalorder %s924_s14, 3 }
   0x5   : > { %s1016_s15 = smov (%p27_p1, %s25_s15), 0  ;;  %p159_p3 = pnand %p842_p0, %p158_p2 }
   0x6   : > { %p191_p4 = scmp.lt.s32.totalorder (!%p159_p3), %s916_s12, 1  ;;  %v210_v0 = vld [vmem:[%s1010_s1] sm:$0xff] (!%p159_p3)  ;;  %vm226_vm0 = vcmask (!%p159_p3), 64512   ;;  %v211_v1 = vld [vmem:[%s1010_s1 + $0x8] sm:$0xff] (!%p159_p3)  ;;  %v926_v2 = vmov (!%p159_p3), 0.0   ;;  %v927_v8 = vmov (!%p159_p3), 0  }
   0x7   : > { %162 = sbr.rel (%p159_p3) target bundleno = 261 (0x105), region = 32  ;;  %562 = vmatprep.mubr.f32.mxu0 (!%p159_p3), %v926_v2  ;;  %299 = vmatprep.mubr.f32.mxu1 (!%p159_p3), %v926_v2  ;;  %v228_v3 = vsel (!%p159_p3), %vm226_vm0, %v210_v0, 0  ;;  %v231_v4 = vsel (!%p159_p3), %vm226_vm0, %v211_v1, 0  ;;  %v214_v5 = vld [vmem:[%s1011_s2] sm:$0xff] (!%p159_p3)  ;;  %v215_v11 = vld [vmem:[%s1011_s2 + $0x8] sm:$0xff] (!%p159_p3) }
   0x8   : > { %v300_v6 = vand.u32 (!%p159_p3), 4294901760, %v228_v3  ;;  %v311_v7 = vand.u32 (!%p159_p3), 4294901760, %v231_v4  ;;  %901 = vset.pattern.permute.xlu0 (!%p159_p3), %v927_v8 }
   0x9   : > { %218 = vperm.xlu0 (!%p159_p3), %901, %v214_v5  }
   0xa   : > { %v301_v9 = vsub.f32 (!%p159_p3), %v228_v3, %v300_v6  ;;  %v312_v10 = vsub.f32 (!%p159_p3), %v231_v4, %v311_v7 }
   0xc   : > { %v302_v14 = vand.u32 (!%p159_p3), 4294901760, %v301_v9  ;;  %v313_v15 = vand.u32 (!%p159_p3), 4294901760, %v312_v10 }
   0xd   : > { %223 = vperm.xlu0 (!%p159_p3), %901, %v215_v11  }
   0xe   : > { %s1018_s12 = smov (!%p191_p4, %s916_s12), 1  ;;  %v303_v18 = vsub.f32 %v301_v9, %v302_v14  ;;  %v314_v19 = vsub.f32 %v312_v10, %v313_v15 }
   0xf   : > { %s849_s22 = sshll.u32 %s1018_s12, 4  ;;  %s850_s28 = sshll.u32 %s1018_s12, 5 }
  0x10   : > { %s198_s27 = scalar_lea.vmem %s1009_s0, %s849_s22  ;;  %v304_v22 = vand.u32 4294901760, %v303_v18  ;;  %v315_v25 = vand.u32 4294901760, %v314_v19  ;;  %s208_s4 = scalar_lea.vmem %s1012_s3, %s850_s28 }
  0x11   : > { %v213_v12 = vld [vmem:[%s198_s27 + $0x8] sm:$0xff]  ;;  %v212_v13 = vld [vmem:[%s198_s27] sm:$0xff] }
  0x12   : > { %v233_v16 = vand.u32 4294901760, %v213_v12  ;;  %v235_v17 = vand.u32 4294901760, %v212_v13 }
  0x14   : > { %497 = vmatprep.subr.mxu0 %v233_v16  ;;  %234 = vmatprep.subr.mxu1 %v233_v16  ;;  %v329_v20 = vsub.f32 %v212_v13, %v235_v17  ;;  %v323_v21 = vsub.f32 %v213_v12, %v233_v16 }
  0x15   : > { %499 = vmatpush1.msra.mxu0 %v235_v17  ;;  %236 = vmatpush1.msra.mxu1 %v235_v17 }
  0x16   : > { %566 = vmatmul.mubr.f32.vlgmr.msra.gmra.mrb[0].mxu0 %v302_v14  ;;  %v324_v23 = vand.u32 4294901760, %v323_v21  ;;  %v330_v24 = vand.u32 4294901760, %v329_v20  ;;  %305 = vmatmul.mubr.f32.vlgmr.msra.gmra.mrb[0].mxu1 %v304_v22 }
  0x17   : > { %571 = vmatprep.mubr.f32.mxu0 %v926_v2  ;;  %310 = vmatprep.mubr.f32.mxu1 %v926_v2 }
  0x18   : > { %v325_v26 = vsub.f32 %v323_v21, %v324_v23  ;;  %584 = vmatprep.subr.mxu0 %v324_v23  ;;  %v331_v27 = vsub.f32 %v329_v20, %v330_v24 }
  0x19   : > { %588 = vmatpush1.msra.mxu0 %v330_v24 }
  0x1a   : > { %575 = vmatmul.mubr.f32.gmra.mrb[2].mxu0 %v313_v15  ;;  %v326_v28 = vand.u32 4294901760, %v325_v26  ;;  %v332_v29 = vand.u32 4294901760, %v331_v27  ;;  %667 = vmatprep.subr.mxu0 %v233_v16 }
  0x1b   : > { %316 = vmatmul.mubr.f32.gmra.mrb[2].mxu1 %v315_v25  ;;  %651 = vmatprep.mubr.f32.mxu0 %v926_v2 }
  0x1c   : > { %327 = vmatprep.subr.mxu1 %v326_v28  ;;  %396 = vmatprep.mubr.f32.mxu1 %v926_v2 }
  0x1d   : > { %333 = vmatpush1.msra.mxu1 %v332_v29 }
  0x1e   : > { %653 = vmatmul.mubr.f32.vlgmr.msra.gmra.mrb[0].mxu0 %v300_v6  ;;  %413 = vmatprep.subr.mxu1 %v323_v21 }
  0x1f   : > { %398 = vmatmul.mubr.f32.vlgmr.msra.gmra.mrb[0].mxu1 %v300_v6  ;;  %658 = vmatprep.mubr.f32.mxu0 %v926_v2 }
  0x20   : > { %403 = vmatprep.mubr.f32.mxu1 %v926_v2  ;;  %416 = vmatpush1.msra.mxu1 %v329_v20 }
  0x21   : > { %669 = vmatpush1.msra.mxu0 %v235_v17 }
  0x22   : > { %660 = vmatmul.mubr.f32.gmra.mrb[2].mxu0 %v311_v7 }
  0x23   : > { %405 = vmatmul.mubr.f32.gmra.mrb[2].mxu1 %v311_v7  ;;  %732 = vmatprep.mubr.f32.mxu0 %v926_v2 }
  0x24   : > { %479 = vmatprep.mubr.f32.mxu1 %v926_v2 }
  0x26   : > { %734 = vmatmul.mubr.f32.vlgmr.msra.gmra.mrb[0].mxu0 %v300_v6 }
  0x27   : > { %482 = vmatmul.mubr.f32.vlgmr.msra.gmra.mrb[0].mxu1 %v301_v9  ;;  %739 = vmatprep.mubr.f32.mxu0 %v926_v2 }
  0x28   : > { %487 = vmatprep.mubr.f32.mxu1 %v926_v2 }
  0x2a   : > { %741 = vmatmul.mubr.f32.gmra.mrb[2].mxu0 %v311_v7 }
  0x2b   : > { %490 = vmatmul.mubr.f32.gmra.mrb[2].mxu1 %v312_v10 }
  0x88   : > { %v219_v30 = vpop.permute.xlu0 %218 }
  0x8c   : > { %v224_v39 = vpop.permute.xlu0 %223 }
  0xf9   : > { %v735_v31 = vpop.f32.mrb[0].mxu0 }
  0xfa   : > { %v483_v32 = vpop.f32.mrb[0].mxu1  ;;  %v737_v33 = vpop.f32.mrb[1].mxu0 }
  0xfb   : > { %v851_v34 = vadd.f32 %v483_v32, %v219_v30  ;;  %v485_v35 = vpop.f32.mrb[1].mxu1 }
  0xfc   : > { %v853_v36 = vadd.f32 %v485_v35, %v219_v30 }
  0xfd   : > { %v852_v37 = vadd.f32 %v851_v34, %v735_v31  ;;  %v742_v38 = vpop.f32.mrb[2].mxu0 }
  0xfe   : > { %v854_v40 = vadd.f32 %v853_v36, %v737_v33  ;;  %v491_v41 = vpop.f32.mrb[2].mxu1  ;;  %v744_v42 = vpop.f32.mrb[3].mxu0 }
  0xff   : > { %747 = vst [vmem:[%s208_s4] sm:$0xff] %v852_v37  ;;  %v855_v43 = vadd.f32 %v491_v41, %v224_v39  ;;  %v493_v44 = vpop.f32.mrb[3].mxu1 }
 0x100   : > { %748 = vst [vmem:[%s208_s4 + $0x8] sm:$0xff] %v854_v40  ;;  %v857_v45 = vadd.f32 %v493_v44, %v224_v39 }
 0x101   : > { %v856_v46 = vadd.f32 %v855_v43, %v742_v38 }
 0x102   : > { %v858_v47 = vadd.f32 %v857_v45, %v744_v42 }
 0x103   : > { %749 = vst [vmem:[%s208_s4 + $0x10] sm:$0xff] %v856_v46 }
 0x104   : > { %750 = vst [vmem:[%s208_s4 + $0x18] sm:$0xff] %v858_v47 }
 0x105 PF: > { %s13_s14 = sadd.s32 1, %s924_s14   ;;  %s1013_s12 = smov %s920_s13 }
 0x106   : > { %p10_p5 = scmp.ge.s32.totalorder %s13_s14, 4   ;;  %s1014_s13 = smov %s1016_s15 }
 0x108   :  { %12 = sbr.rel (!%p10_p5) target bundleno = 2 (0x2), region = 62 }

</bundles_post_ra>
